<compile_context>
chip_gen: v5e
topology: v5e:2x2
jax: 0.10.0
libtpu: 0.0.40
codegen_flags: <defaults>
</compile_context>

<pallas_src>
import functools

import jax
import jax.numpy as jnp
from jax.experimental import pallas as pl
from jax.experimental.pallas import tpu as pltpu

# ---- packed-buffer layout (row offsets, all multiples of 128) --------------
D_IN = 40
H1 = 256
H2 = 128
LANES = 256
R_W1 = 0      # (128, 256)  rows [0,40)   hold enc1 weight (rest zero)
R_W2 = 128    # (256, 256)  lanes [0,128) hold enc2 weight
R_WMV = 384   # (128, 256)  mean in lanes [0,z), var in lanes [128,128+z)
R_WD1 = 512   # (128, 256)  rows [0,z), lanes [0,128) hold dec1 weight
R_WD2 = 640   # (128, 256)  dec2 weight
R_WD3 = 768   # (256, 256)  lanes [0,40) hold dec3 weight
TOTAL_ROWS = 1024

MAX_TILE_B = 1024   # batch-tile cap (sweep candidate 512-2048); ~6-8 MiB live VMEM


def vae_kernel(x_ref, eps_ref, w_ref, b_ref, out_ref):
    bf16 = jnp.bfloat16
    f32 = jnp.float32

    # x / eps arrive as bf16, zero-padded to 128 lanes.
    x = x_ref[...]                                                 # (Bt, 128) bf16

    # ----- encoder -----
    h = jnp.dot(x, w_ref[R_W1:R_W1 + 128, :],
                preferred_element_type=f32) + b_ref[0:1, :]        # (Bt, 256)
    h = jnp.maximum(h, 0.0)
    h = jnp.dot(h.astype(bf16), w_ref[R_W2:R_W2 + 256, 0:128],
                preferred_element_type=f32) + b_ref[1:2, 0:128]    # (Bt, 128)
    h = jnp.maximum(h, 0.0)

    # fused mean|var projection: mean -> lanes [0,128), raw var -> lanes [128,256)
    mv = jnp.dot(h.astype(bf16), w_ref[R_WMV:R_WMV + 128, :],
                 preferred_element_type=f32) + b_ref[2:3, :]       # (Bt, 256)
    mean = mv[:, 0:128]                          # lanes >= z_dim are exactly 0
    var = jnp.logaddexp(0.0, mv[:, 128:256])     # softplus, f32

    # ----- reparameterization: z = mean + sqrt(var) * eps -----
    # eps is zero-padded beyond z_dim, so padded lanes of z stay exactly 0.
    z = mean + jnp.sqrt(var) * eps_ref[...].astype(f32)            # (Bt, 128) f32
    zb = z.astype(bf16)
    out_ref[:, 128:256] = zb                     # z in lanes [128, 256)

    # ----- decoder -----
    d = jnp.dot(zb, w_ref[R_WD1:R_WD1 + 128, 0:128],
                preferred_element_type=f32) + b_ref[3:4, 0:128]    # (Bt, 128)
    d = jnp.maximum(d, 0.0)
    d = jnp.dot(d.astype(bf16), w_ref[R_WD2:R_WD2 + 128, :],
                preferred_element_type=f32) + b_ref[4:5, :]        # (Bt, 256)
    d = jnp.maximum(d, 0.0)
    logits = jnp.dot(d.astype(bf16), w_ref[R_WD3:R_WD3 + 256, 0:128],
                     preferred_element_type=f32) + b_ref[5:6, 0:128]
    # exact sigmoid via a single EUP op; output guaranteed in [0, 1]
    out_ref[:, 0:128] = (0.5 * jnp.tanh(0.5 * logits) + 0.5).astype(bf16)


def pack_params(params, z_dim):
    """Pack per-layer (W[in,out], b[out]) params into one bf16 weight slab and
    one f32 bias slab with the static layout the kernel expects."""
    assert z_dim <= 128
    (w1, b1), (w2, b2), (wm, bm), (wv, bv), (wd1, bd1), (wd2, bd2), (wd3, bd3) = params

    W = jnp.zeros((TOTAL_ROWS, LANES), jnp.float32)
    W = W.at[R_W1:R_W1 + D_IN, :].set(w1)                    # (40, 256)
    W = W.at[R_W2:R_W2 + H1, 0:H2].set(w2)                   # (256, 128)
    W = W.at[R_WMV:R_WMV + H2, 0:z_dim].set(wm)              # (128, z)
    W = W.at[R_WMV:R_WMV + H2, 128:128 + z_dim].set(wv)      # (128, z)
    W = W.at[R_WD1:R_WD1 + z_dim, 0:H2].set(wd1)             # (z, 128)
    W = W.at[R_WD2:R_WD2 + H2, :].set(wd2)                   # (128, 256)
    W = W.at[R_WD3:R_WD3 + H1, 0:D_IN].set(wd3)              # (256, 40)
    W = W.astype(jnp.bfloat16)

    B = jnp.zeros((8, LANES), jnp.float32)
    B = B.at[0, :].set(b1)
    B = B.at[1, 0:H2].set(b2)
    B = B.at[2, 0:z_dim].set(bm)
    B = B.at[2, 128:128 + z_dim].set(bv)
    B = B.at[3, 0:H2].set(bd1)
    B = B.at[4, :].set(bd2)
    B = B.at[5, 0:D_IN].set(bd3)
    return W, B


def _round_up(n, m):
    return -(-n // m) * m


def _choose_tile_b(batch):
    """Pick a batch tile: up to MAX_TILE_B rows, but always >= 2 tiles for any
    batch big enough so the 'parallel' axis can use both v7x TensorCores."""
    b8 = _round_up(batch, 8)
    if b8 <= 16:                       # tiny batches: one tile is unavoidable
        return b8
    half = _round_up(-(-b8 // 2), 8)   # ceil(b8/2) rounded to sublane multiple
    return max(8, min(MAX_TILE_B, half))


def vae_forward(x, eps, packed_w, packed_b, *, z_dim):
    """x: [B, 40] f32, eps: [B, z_dim] f32. Returns (x_recon [B,40], z [B,z_dim])."""
    B, d_in = x.shape
    assert d_in == D_IN and eps.shape == (B, z_dim) and z_dim <= 128

    tile_b = _choose_tile_b(B)
    B_pad = _round_up(B, tile_b)
    num_tiles = B_pad // tile_b

    # bf16, lane-dense (128-wide) activations in; one fused bf16 (.,256) slab out.
    x_p = jnp.pad(x.astype(jnp.bfloat16), ((0, B_pad - B), (0, 128 - d_in)))
    eps_p = jnp.pad(eps.astype(jnp.bfloat16), ((0, B_pad - B), (0, 128 - z_dim)))

    flops = 2 * B_pad * (128 * 256 + 256 * 128 + 128 * 256
                         + 128 * 128 + 128 * 256 + 256 * 128)
    bytes_accessed = (packed_w.size * 2 + packed_b.size * 4
                      + x_p.size * 2 + eps_p.size * 2 + B_pad * 256 * 2)
    transcendentals = B_pad * 3 * 128   # softplus(exp+log) + tanh

    out = pl.pallas_call(
        vae_kernel,
        grid=(num_tiles,),
        in_specs=[
            pl.BlockSpec((tile_b, 128), lambda i: (i, 0)),          # x (bf16)
            pl.BlockSpec((tile_b, 128), lambda i: (i, 0)),          # eps (bf16)
            pl.BlockSpec((TOTAL_ROWS, LANES), lambda i: (0, 0)),    # packed weights
            pl.BlockSpec((8, LANES), lambda i: (0, 0)),             # packed biases
        ],
        out_specs=pl.BlockSpec((tile_b, 256), lambda i: (i, 0)),    # [x_recon | z]
        out_shape=jax.ShapeDtypeStruct((B_pad, 256), jnp.bfloat16),
        compiler_params=pltpu.CompilerParams(
            dimension_semantics=("parallel",),
            vmem_limit_bytes=32 * 1024 * 1024),
        cost_estimate=pl.CostEstimate(
            flops=flops, transcendentals=transcendentals,
            bytes_accessed=bytes_accessed),
    )(x_p, eps_p, packed_w, packed_b)

    x_recon = out[:B, 0:D_IN].astype(jnp.float32)
    z = out[:B, 128:128 + z_dim].astype(jnp.float32)
    return x_recon, z


def init_params(key, z_dim):
    """Synthetic parameters matching the nn.Linear shapes (W stored as [in, out])."""
    dims = [
        (40, 256),     # dense_enc1
        (256, 128),    # dense_enc2
        (128, z_dim),  # dense_encmean
        (128, z_dim),  # dense_encvar
        (z_dim, 128),  # dense_dec1
        (128, 256),    # dense_dec2
        (256, 40),     # dense_dec3
    ]
    params = []
    for fan_in, fan_out in dims:
        key, kw, kb = jax.random.split(key, 3)
        scale = 1.0 / jnp.sqrt(float(fan_in))
        w = jax.random.uniform(kw, (fan_in, fan_out), jnp.float32, -scale, scale)
        b = jax.random.uniform(kb, (fan_out,), jnp.float32, -scale, scale)
        params.append((w, b))
    return params


def vae_reference(x, eps, params):
    """Plain-JAX reference with the same precision policy as the kernel
    (bf16 matmul inputs and eps, f32 accumulation / elementwise)."""
    bf16 = jnp.bfloat16

    def dense(a, w, b):
        return jnp.dot(a.astype(bf16), w.astype(bf16),
                       preferred_element_type=jnp.float32) + b

    (w1, b1), (w2, b2), (wm, bm), (wv, bv), (wd1, bd1), (wd2, bd2), (wd3, bd3) = params
    h = jnp.maximum(dense(x, w1, b1), 0.0)
    h = jnp.maximum(dense(h, w2, b2), 0.0)
    mean = dense(h, wm, bm)
    var = jnp.logaddexp(0.0, dense(h, wv, bv))
    z = mean + jnp.sqrt(var) * eps.astype(bf16).astype(jnp.float32)
    d = jnp.maximum(dense(z, wd1, bd1), 0.0)
    d = jnp.maximum(dense(d, wd2, bd2), 0.0)
    xr = jax.nn.sigmoid(dense(d, wd3, bd3))
    return xr, z


def _check(fwd, params, key, batch, z_dim, atol=3e-2):
    k_x, k_eps = jax.random.split(key)
    x = jax.random.uniform(k_x, (batch, D_IN), jnp.float32)        # data in [0, 1]
    eps = jax.random.normal(k_eps, (batch, z_dim), jnp.float32)
    x_recon, z = fwd(x, eps)
    jax.block_until_ready((x_recon, z))

    assert x_recon.shape == (batch, D_IN) and z.shape == (batch, z_dim)
    assert bool(jnp.all(jnp.isfinite(x_recon))) and bool(jnp.all(jnp.isfinite(z)))
    assert bool(jnp.all(x_recon >= 0.0)) and bool(jnp.all(x_recon <= 1.0))

    xr_ref, z_ref = vae_reference(x, eps, params)
    # kernel outputs are bf16; round the reference the same way before comparing
    xr_ref = xr_ref.astype(jnp.bfloat16).astype(jnp.float32)
    z_ref = z_ref.astype(jnp.bfloat16).astype(jnp.float32)
    assert bool(jnp.allclose(x_recon, xr_ref, atol=atol)), "x_recon mismatch vs reference"
    assert bool(jnp.allclose(z, z_ref, atol=atol)), "z mismatch vs reference"


if __name__ == "__main__":
    B = 8
    Z_DIM = 16

    key = jax.random.PRNGKey(0)
    k_data, k_data2, k_p = jax.random.split(key, 3)

    # TODO(synk): torch.randn inside _sample_z has no in-kernel equivalent here;
    # the Gaussian eps is generated with jax.random and passed in (the
    # reparameterization math itself runs inside the kernel).
    params = init_params(k_p, Z_DIM)
    packed_w, packed_b = pack_params(params, Z_DIM)

    def fwd(x, eps):
        return jax.jit(functools.partial(vae_forward, z_dim=Z_DIM))(
            x, eps, packed_w, packed_b)

    # small-batch (single-tile) path
    _check(fwd, params, k_data, batch=B, z_dim=Z_DIM)
    # multi-tile "parallel" path (2 grid tiles, exercises batch padding)
    _check(fwd, params, k_data2, batch=200, z_dim=Z_DIM)

    print("KERNEL_OK")
</pallas_src>

<mosaic_0001>
module attributes {stable_mosaic.version = 11 : i64} {
  func.func @vae_kernel(%arg0: i32, %arg1: memref<8x128xbf16, #tpu.memory_space<vmem>>, %arg2: memref<8x128xbf16, #tpu.memory_space<vmem>>, %arg3: memref<1024x256xbf16, #tpu.memory_space<vmem>>, %arg4: memref<8x256xf32, #tpu.memory_space<vmem>>, %arg5: memref<8x256xbf16, #tpu.memory_space<vmem>>) attributes {dimension_semantics = [#tpu.dimension_semantics<parallel>], iteration_bounds = array<i64: 1>, scalar_prefetch = 0 : i64, scratch_operands = 0 : i64, tpu.core_type = #tpu.core_type<tc>, window_params = [{transform_indices = @transform_0, window_bounds = array<i64: 8, 128>}, {transform_indices = @transform_1, window_bounds = array<i64: 8, 128>}, {pipeline_mode = #tpu.pipeline_mode<synchronous>, transform_indices = @transform_2, window_bounds = array<i64: 1024, 256>}, {pipeline_mode = #tpu.pipeline_mode<synchronous>, transform_indices = @transform_3, window_bounds = array<i64: 8, 256>}, {transform_indices = @transform_4, window_bounds = array<i64: 8, 256>}]} {
    %c0 = arith.constant 0 : index
    %c0_0 = arith.constant 0 : index
    %0 = vector.load %arg1[%c0, %c0_0] : memref<8x128xbf16, #tpu.memory_space<vmem>>, vector<8x128xbf16>
    %c0_1 = arith.constant 0 : index
    %c0_2 = arith.constant 0 : index
    %1 = vector.load %arg3[%c0_1, %c0_2] : memref<1024x256xbf16, #tpu.memory_space<vmem>>, vector<128x256xbf16>
    %cst = arith.constant dense<0.000000e+00> : vector<8x256xf32>
    %2 = tpu.matmul %0, %1, %cst {dimension_numbers = #tpu.dot_dimension_numbers<[1], [0], [0], [1], [0, 0, 1, 1], [], []>} : vector<8x128xbf16>, vector<128x256xbf16>, vector<8x256xf32> -> vector<8x256xf32>
    %c0_3 = arith.constant 0 : index
    %c0_4 = arith.constant 0 : index
    %3 = vector.load %arg4[%c0_3, %c0_4] : memref<8x256xf32, #tpu.memory_space<vmem>>, vector<1x256xf32>
    %4 = vector.broadcast %3 : vector<1x256xf32> to vector<8x256xf32>
    %5 = arith.addf %2, %4 : vector<8x256xf32>
    %cst_5 = arith.constant 0.000000e+00 : f32
    %6 = vector.broadcast %cst_5 : f32 to vector<8x256xf32>
    %7 = arith.maximumf %5, %6 : vector<8x256xf32>
    %8 = arith.truncf %7 : vector<8x256xf32> to vector<8x256xbf16>
    %c128 = arith.constant 128 : index
    %c0_6 = arith.constant 0 : index
    %9 = vector.load %arg3[%c128, %c0_6] : memref<1024x256xbf16, #tpu.memory_space<vmem>>, vector<256x128xbf16>
    %cst_7 = arith.constant dense<0.000000e+00> : vector<8x128xf32>
    %10 = tpu.matmul %8, %9, %cst_7 {dimension_numbers = #tpu.dot_dimension_numbers<[1], [0], [0], [1], [0, 0, 1, 1], [], []>} : vector<8x256xbf16>, vector<256x128xbf16>, vector<8x128xf32> -> vector<8x128xf32>
    %c1 = arith.constant 1 : index
    %c0_8 = arith.constant 0 : index
    %11 = vector.load %arg4[%c1, %c0_8] : memref<8x256xf32, #tpu.memory_space<vmem>>, vector<1x128xf32>
    %12 = vector.broadcast %11 : vector<1x128xf32> to vector<8x128xf32>
    %13 = arith.addf %10, %12 : vector<8x128xf32>
    %cst_9 = arith.constant 0.000000e+00 : f32
    %14 = vector.broadcast %cst_9 : f32 to vector<8x128xf32>
    %15 = arith.maximumf %13, %14 : vector<8x128xf32>
    %16 = arith.truncf %15 : vector<8x128xf32> to vector<8x128xbf16>
    %c384 = arith.constant 384 : index
    %c0_10 = arith.constant 0 : index
    %17 = vector.load %arg3[%c384, %c0_10] : memref<1024x256xbf16, #tpu.memory_space<vmem>>, vector<128x256xbf16>
    %cst_11 = arith.constant dense<0.000000e+00> : vector<8x256xf32>
    %18 = tpu.matmul %16, %17, %cst_11 {dimension_numbers = #tpu.dot_dimension_numbers<[1], [0], [0], [1], [0, 0, 1, 1], [], []>} : vector<8x128xbf16>, vector<128x256xbf16>, vector<8x256xf32> -> vector<8x256xf32>
    %c2 = arith.constant 2 : index
    %c0_12 = arith.constant 0 : index
    %19 = vector.load %arg4[%c2, %c0_12] : memref<8x256xf32, #tpu.memory_space<vmem>>, vector<1x256xf32>
    %20 = vector.broadcast %19 : vector<1x256xf32> to vector<8x256xf32>
    %21 = arith.addf %18, %20 : vector<8x256xf32>
    %22 = vector.extract_strided_slice %21 {offsets = [0, 0], sizes = [8, 128], strides = [1, 1]} : vector<8x256xf32> to vector<8x128xf32>
    %23 = vector.extract_strided_slice %21 {offsets = [0, 128], sizes = [8, 128], strides = [1, 1]} : vector<8x256xf32> to vector<8x128xf32>
    %cst_13 = arith.constant 0.000000e+00 : f32
    %24 = vector.broadcast %cst_13 : f32 to vector<8x128xf32>
    %25 = arith.maximumf %24, %23 : vector<8x128xf32>
    %26 = vector.broadcast %cst_13 : f32 to vector<8x128xf32>
    %27 = arith.subf %26, %23 : vector<8x128xf32>
    %28 = arith.cmpf one, %27, %27 : vector<8x128xf32>
    %29 = vector.broadcast %cst_13 : f32 to vector<8x128xf32>
    %30 = arith.addf %29, %23 : vector<8x128xf32>
    %31 = math.absf %27 : vector<8x128xf32>
    %cst_14 = arith.constant 0.000000e+00 : f32
    %32 = vector.broadcast %cst_14 : f32 to vector<8x128xf32>
    %33 = arith.subf %32, %31 : vector<8x128xf32>
    %34 = math.exp %33 : vector<8x128xf32>
    %35 = math.log1p %34 : vector<8x128xf32>
    %36 = arith.addf %25, %35 : vector<8x128xf32>
    %37 = arith.select %28, %30, %36 : vector<8x128xi1>, vector<8x128xf32>
    %38 = math.sqrt %37 : vector<8x128xf32>
    %c0_15 = arith.constant 0 : index
    %c0_16 = arith.constant 0 : index
    %39 = vector.load %arg2[%c0_15, %c0_16] : memref<8x128xbf16, #tpu.memory_space<vmem>>, vector<8x128xbf16>
    %40 = arith.extf %39 : vector<8x128xbf16> to vector<8x128xf32>
    %41 = arith.mulf %38, %40 : vector<8x128xf32>
    %42 = arith.addf %22, %41 : vector<8x128xf32>
    %43 = arith.truncf %42 : vector<8x128xf32> to vector<8x128xbf16>
    %c0_17 = arith.constant 0 : index
    %c128_18 = arith.constant 128 : index
    %44 = vector.load %arg5[%c0_17, %c128_18] : memref<8x256xbf16, #tpu.memory_space<vmem>>, vector<8x128xbf16>
    tpu.vector_store %arg5[%c0_17, %c128_18], %43 {strides = array<i32>} : memref<8x256xbf16, #tpu.memory_space<vmem>>, vector<8x128xbf16>,
    %c512 = arith.constant 512 : index
    %c0_19 = arith.constant 0 : index
    %45 = vector.load %arg3[%c512, %c0_19] : memref<1024x256xbf16, #tpu.memory_space<vmem>>, vector<128x128xbf16>
    %cst_20 = arith.constant dense<0.000000e+00> : vector<8x128xf32>
    %46 = tpu.matmul %43, %45, %cst_20 {dimension_numbers = #tpu.dot_dimension_numbers<[1], [0], [0], [1], [0, 0, 1, 1], [], []>} : vector<8x128xbf16>, vector<128x128xbf16>, vector<8x128xf32> -> vector<8x128xf32>
    %c3 = arith.constant 3 : index
    %c0_21 = arith.constant 0 : index
    %47 = vector.load %arg4[%c3, %c0_21] : memref<8x256xf32, #tpu.memory_space<vmem>>, vector<1x128xf32>
    %48 = vector.broadcast %47 : vector<1x128xf32> to vector<8x128xf32>
    %49 = arith.addf %46, %48 : vector<8x128xf32>
    %cst_22 = arith.constant 0.000000e+00 : f32
    %50 = vector.broadcast %cst_22 : f32 to vector<8x128xf32>
    %51 = arith.maximumf %49, %50 : vector<8x128xf32>
    %52 = arith.truncf %51 : vector<8x128xf32> to vector<8x128xbf16>
    %c640 = arith.constant 640 : index
    %c0_23 = arith.constant 0 : index
    %53 = vector.load %arg3[%c640, %c0_23] : memref<1024x256xbf16, #tpu.memory_space<vmem>>, vector<128x256xbf16>
    %cst_24 = arith.constant dense<0.000000e+00> : vector<8x256xf32>
    %54 = tpu.matmul %52, %53, %cst_24 {dimension_numbers = #tpu.dot_dimension_numbers<[1], [0], [0], [1], [0, 0, 1, 1], [], []>} : vector<8x128xbf16>, vector<128x256xbf16>, vector<8x256xf32> -> vector<8x256xf32>
    %c4 = arith.constant 4 : index
    %c0_25 = arith.constant 0 : index
    %55 = vector.load %arg4[%c4, %c0_25] : memref<8x256xf32, #tpu.memory_space<vmem>>, vector<1x256xf32>
    %56 = vector.broadcast %55 : vector<1x256xf32> to vector<8x256xf32>
    %57 = arith.addf %54, %56 : vector<8x256xf32>
    %cst_26 = arith.constant 0.000000e+00 : f32
    %58 = vector.broadcast %cst_26 : f32 to vector<8x256xf32>
    %59 = arith.maximumf %57, %58 : vector<8x256xf32>
    %60 = arith.truncf %59 : vector<8x256xf32> to vector<8x256xbf16>
    %c768 = arith.constant 768 : index
    %c0_27 = arith.constant 0 : index
    %61 = vector.load %arg3[%c768, %c0_27] : memref<1024x256xbf16, #tpu.memory_space<vmem>>, vector<256x128xbf16>
    %cst_28 = arith.constant dense<0.000000e+00> : vector<8x128xf32>
    %62 = tpu.matmul %60, %61, %cst_28 {dimension_numbers = #tpu.dot_dimension_numbers<[1], [0], [0], [1], [0, 0, 1, 1], [], []>} : vector<8x256xbf16>, vector<256x128xbf16>, vector<8x128xf32> -> vector<8x128xf32>
    %c5 = arith.constant 5 : index
    %c0_29 = arith.constant 0 : index
    %63 = vector.load %arg4[%c5, %c0_29] : memref<8x256xf32, #tpu.memory_space<vmem>>, vector<1x128xf32>
    %64 = vector.broadcast %63 : vector<1x128xf32> to vector<8x128xf32>
    %65 = arith.addf %62, %64 : vector<8x128xf32>
    %cst_30 = arith.constant 5.000000e-01 : f32
    %66 = vector.broadcast %cst_30 : f32 to vector<8x128xf32>
    %67 = arith.mulf %66, %65 : vector<8x128xf32>
    %68 = math.tanh %67 : vector<8x128xf32>
    %cst_31 = arith.constant 5.000000e-01 : f32
    %69 = vector.broadcast %cst_31 : f32 to vector<8x128xf32>
    %70 = arith.mulf %69, %68 : vector<8x128xf32>
    %cst_32 = arith.constant 5.000000e-01 : f32
    %71 = vector.broadcast %cst_32 : f32 to vector<8x128xf32>
    %72 = arith.addf %70, %71 : vector<8x128xf32>
    %73 = arith.truncf %72 : vector<8x128xf32> to vector<8x128xbf16>
    %c0_33 = arith.constant 0 : index
    %c0_34 = arith.constant 0 : index
    %74 = vector.load %arg5[%c0_33, %c0_34] : memref<8x256xbf16, #tpu.memory_space<vmem>>, vector<8x128xbf16>
    tpu.vector_store %arg5[%c0_33, %c0_34], %73 {strides = array<i32>} : memref<8x256xbf16, #tpu.memory_space<vmem>>, vector<8x128xbf16>,
    return
  }
  func.func @transform_0(%arg0: i32) -> (i32, i32) {
    %c0_i32 = arith.constant 0 : i32
    %c0_i32_0 = arith.constant 0 : i32
    return %arg0, %c0_i32 : i32, i32
  }
  func.func @transform_1(%arg0: i32) -> (i32, i32) {
    %c0_i32 = arith.constant 0 : i32
    %c0_i32_0 = arith.constant 0 : i32
    return %arg0, %c0_i32 : i32, i32
  }
  func.func @transform_2(%arg0: i32) -> (i32, i32) {
    %c0_i32 = arith.constant 0 : i32
    %c0_i32_0 = arith.constant 0 : i32
    %c0_i32_1 = arith.constant 0 : i32
    return %c0_i32, %c0_i32_0 : i32, i32
  }
  func.func @transform_3(%arg0: i32) -> (i32, i32) {
    %c0_i32 = arith.constant 0 : i32
    %c0_i32_0 = arith.constant 0 : i32
    %c0_i32_1 = arith.constant 0 : i32
    return %c0_i32, %c0_i32_0 : i32, i32
  }
  func.func @transform_4(%arg0: i32) -> (i32, i32) {
    %c0_i32 = arith.constant 0 : i32
    %c0_i32_0 = arith.constant 0 : i32
    return %arg0, %c0_i32 : i32, i32
  }
}

</mosaic_0001>

<bundles_post_ra>
// kernel: vae_forward.1
= control target key start
LH: loop header
LB: loop body
LE: loop exit
PB: predicated region body
PF: predicated region fallthrough
CT: control target
= control target key end

     0   :  { %9 = vsyncpa [#allocation3], 0  ;;  %s1347_s18 = smov [#allocation2]   ;;  %s1348_s20 = smov 128   ;;  %s1415_s0 = inlined_call_operand.vmem [shape: bf16[8,128], index: 0, kind: input, shape index: {}]   ;;  %s1416_s1 = inlined_call_operand.vmem [shape: bf16[8,128], index: 1, kind: input, shape index: {}]   ;;  %s1417_s2 = inlined_call_operand.hbm [shape: bf16[1024,256], index: 2, kind: input, shape index: {}]   ;;  %s1418_s3 = inlined_call_operand.vmem [shape: f32[8,256], index: 3, kind: input, shape index: {}]   ;;  %s1419_s4 = inlined_call_operand.vmem [shape: bf16[8,256], index: 4, kind: output, shape index: {}]  }
   0x1   :  { %s18_s17 = sshll.u32 %s1417_s2, 4  ;;  %s20_s19 = sshll.u32 %s1347_s18, 4  ;;  %s19_s17 = int_to_ptr.hbm [resolvable:$true] %s18_s17  ;;  %s21_s19 = int_to_ptr.vmem [resolvable:$true] %s20_s19 }
   0x2   :  { %s1349_s21 = smov 8  }
   0x3   :  { %26 = dma.hbm_to_vmem [thread:$0]  %s19_s17, 16384, %s21_s19, [#allocation3], %s1348_s20, %s1348_s20, %s1349_s21  }
   0x4   :  { %1345 = dma.done.wait [#allocation3], 16384  }
   0x5   :  { %1346 = vsyncadd [#allocation3], 4294950912  ;;  %v926_v0 = vld [vmem:[#allocation2 + $0x70] sm:$0xf]  ;;  %v1237_v1 = vld [vmem:[#allocation2 + $0x74] sm:$0xf0] }
   0x6   :  { %v1236_v2 = vld [vmem:[#allocation2 + $0x74] sm:$0xf]  ;;  %v927_v3 = vor.u32 %v1237_v1, %v926_v0  ;;  %v928_v4 = vld [vmem:[#allocation2 + $0x78] sm:$0xf0]  ;;  %v918_v5 = vld [vmem:[#allocation2 + $0x60] sm:$0xf] }
   0x7   :  { %v1235_v6 = vld [vmem:[#allocation2 + $0x64] sm:$0xf0]  ;;  %v931_v7 = vor.u32 %v1236_v2, %v928_v4  ;;  %v1234_v8 = vld [vmem:[#allocation2 + $0x64] sm:$0xf]  ;;  %v920_v9 = vld [vmem:[#allocation2 + $0x68] sm:$0xf0] }
   0x8   :  { %136 = vmatpush.bf16.msra.mxu0 %v927_v3  ;;  %v919_v10 = vor.u32 %v1235_v6, %v918_v5  ;;  %v923_v11 = vor.u32 %v1234_v8, %v920_v9  ;;  %v910_v12 = vld [vmem:[#allocation2 + $0x50] sm:$0xf]  ;;  %v1233_v13 = vld [vmem:[#allocation2 + $0x54] sm:$0xf0]  ;;  %v1232_v14 = vld [vmem:[#allocation2 + $0x54] sm:$0xf] }
   0x9   :  { %149 = vmatpush.bf16.msra.mxu1 %v931_v7  ;;  %v912_v15 = vld [vmem:[#allocation2 + $0x58] sm:$0xf0]  ;;  %v911_v16 = vor.u32 %v1233_v13, %v910_v12  ;;  %v902_v18 = vld [vmem:[#allocation2 + $0x40] sm:$0xf]  ;;  %v1231_v19 = vld [vmem:[#allocation2 + $0x44] sm:$0xf0] }
   0xa   :  { %v915_v17 = vor.u32 %v1232_v14, %v912_v15  ;;  %v1230_v20 = vld [vmem:[#allocation2 + $0x44] sm:$0xf]  ;;  %v904_v21 = vld [vmem:[#allocation2 + $0x48] sm:$0xf0]  ;;  %v894_v22 = vld [vmem:[#allocation2 + $0x30] sm:$0xf]  ;;  %v903_v24 = vor.u32 %v1231_v19, %v902_v18 }
   0xb   :  { %v1229_v23 = vld [vmem:[#allocation2 + $0x34] sm:$0xf0]  ;;  %v1228_v25 = vld [vmem:[#allocation2 + $0x34] sm:$0xf]  ;;  %v962_v26 = vld [vmem:[#allocation2 + $0xf0] sm:$0xf]  ;;  %v907_v29 = vor.u32 %v1230_v20, %v904_v21 }
   0xc   :  { %137 = vmatpush.bf16.msra.mxu0 %v919_v10  ;;  %v1245_v27 = vld [vmem:[#allocation2 + $0xf4] sm:$0xf0]  ;;  %v994_v28 = vld [vmem:[#allocation2 + $0x170] sm:$0xf]  ;;  %v958_v32 = vld [vmem:[#allocation2 + $0xe0] sm:$0xf]  ;;  %v895_v39 = vor.u32 %v1229_v23, %v894_v22 }
   0xd   :  { %150 = vmatpush.bf16.msra.mxu1 %v923_v11  ;;  %v963_v30 = vor.u32 %v1245_v27, %v962_v26  ;;  %v1253_v31 = vld [vmem:[#allocation2 + $0x174] sm:$0xf0]  ;;  %v1244_v33 = vld [vmem:[#allocation2 + $0xe4] sm:$0xf0]  ;;  %v896_v34 = vld [vmem:[#allocation2 + $0x38] sm:$0xf0] }
   0xe   :  { %v995_v35 = vor.u32 %v1253_v31, %v994_v28  ;;  %v990_v36 = vld [vmem:[#allocation2 + $0x160] sm:$0xf]  ;;  %v1252_v37 = vld [vmem:[#allocation2 + $0x164] sm:$0xf0]  ;;  %v959_v38 = vor.u32 %v1244_v33, %v958_v32  ;;  %v954_v42 = vld [vmem:[#allocation2 + $0xd0] sm:$0xf]  ;;  %v899_v44 = vor.u32 %v1228_v25, %v896_v34 }
   0xf   :  { %295 = vmatpush.bf16.msra.mxu2 %v963_v30  ;;  %v886_v40 = vld [vmem:[#allocation2 + $0x20] sm:$0xf]  ;;  %v991_v41 = vor.u32 %v1252_v37, %v990_v36  ;;  %v1243_v43 = vld [vmem:[#allocation2 + $0xd4] sm:$0xf0]  ;;  %v1227_v45 = vld [vmem:[#allocation2 + $0x24] sm:$0xf0] }
  0x10   :  { %138 = vmatpush.bf16.msra.mxu0 %v911_v16  ;;  %308 = vmatpush.bf16.msra.mxu3 %v995_v35  ;;  %v986_v46 = vld [vmem:[#allocation2 + $0x150] sm:$0xf]  ;;  %v1251_v47 = vld [vmem:[#allocation2 + $0x154] sm:$0xf0]  ;;  %v1226_v48 = vld [vmem:[#allocation2 + $0x24] sm:$0xf]  ;;  %v955_v50 = vor.u32 %v1243_v43, %v954_v42  ;;  %v887_v51 = vor.u32 %v1227_v45, %v886_v40 }
  0x11   :  { %151 = vmatpush.bf16.msra.mxu1 %v915_v17  ;;  %v888_v49 = vld [vmem:[#allocation2 + $0x28] sm:$0xf0]  ;;  %v878_v52 = vld [vmem:[#allocation2 + $0x10] sm:$0xf]  ;;  %v987_v53 = vor.u32 %v1251_v47, %v986_v46  ;;  %v950_v54 = vld [vmem:[#allocation2 + $0xc0] sm:$0xf] }
  0x12   :  { %v1242_v55 = vld [vmem:[#allocation2 + $0xc4] sm:$0xf0]  ;;  %v891_v56 = vor.u32 %v1226_v48, %v888_v49  ;;  %v1225_v57 = vld [vmem:[#allocation2 + $0x14] sm:$0xf0]  ;;  %v982_v58 = vld [vmem:[#allocation2 + $0x140] sm:$0xf] }
  0x13   :  { %296 = vmatpush.bf16.msra.mxu2 %v959_v38  ;;  %v1250_v59 = vld [vmem:[#allocation2 + $0x144] sm:$0xf0]  ;;  %v1224_v60 = vld [vmem:[#allocation2 + $0x14] sm:$0xf]  ;;  %v880_v61 = vld [vmem:[#allocation2 + $0x18] sm:$0xf0]  ;;  %v951_v62 = vor.u32 %v1242_v55, %v950_v54  ;;  %v879_v63 = vor.u32 %v1225_v57, %v878_v52 }
  0x14   :  { %139 = vmatpush.bf16.msra.mxu0 %v903_v24  ;;  %309 = vmatpush.bf16.msra.mxu3 %v991_v41  ;;  %v870_v0 = vld [vmem:[#allocation2] sm:$0xf]  ;;  %v983_v1 = vor.u32 %v1250_v59, %v982_v58  ;;  %v946_v2 = vld [vmem:[#allocation2 + $0xb0] sm:$0xf]  ;;  %v1241_v3 = vld [vmem:[#allocation2 + $0xb4] sm:$0xf0]  ;;  %v883_v4 = vor.u32 %v1224_v60, %v880_v61 }
  0x15   :  { %152 = vmatpush.bf16.msra.mxu1 %v907_v29  ;;  %v1223_v5 = vld [vmem:[#allocation2 + $0x4] sm:$0xf0]  ;;  %v978_v6 = vld [vmem:[#allocation2 + $0x130] sm:$0xf]  ;;  %v1249_v7 = vld [vmem:[#allocation2 + $0x134] sm:$0xf0]  ;;  %v947_v10 = vor.u32 %v1241_v3, %v946_v2 }
  0x16   :  { %v1222_v8 = vld [vmem:[#allocation2 + $0x4] sm:$0xf]  ;;  %v872_v9 = vld [vmem:[#allocation2 + $0x8] sm:$0xf0]  ;;  %v871_v11 = vor.u32 %v1223_v5, %v870_v0  ;;  %v979_v12 = vor.u32 %v1249_v7, %v978_v6  ;;  %v942_v13 = vld [vmem:[#allocation2 + $0xa0] sm:$0xf] }
  0x17   :  { %297 = vmatpush.bf16.msra.mxu2 %v955_v50  ;;  %v1240_v14 = vld [vmem:[#allocation2 + $0xa4] sm:$0xf0]  ;;  %v875_v15 = vor.u32 %v1222_v8, %v872_v9  ;;  %v974_v16 = vld [vmem:[#allocation2 + $0x120] sm:$0xf]  ;;  %v938_v21 = vld [vmem:[#allocation2 + $0x90] sm:$0xf] }
  0x18   :  { %140 = vmatpush.bf16.msra.mxu0 %v895_v39  ;;  %310 = vmatpush.bf16.msra.mxu3 %v987_v53  ;;  %v1248_v17 = vld [vmem:[#allocation2 + $0x124] sm:$0xf0]  ;;  %v943_v18 = vor.u32 %v1240_v14, %v942_v13  ;;  %v33_v19 = vld [vmem:[%s1415_s0] sm:$0xf]  ;;  %v1239_v22 = vld [vmem:[#allocation2 + $0x94] sm:$0xf0] }
  0x19   :  { %153 = vmatpush.bf16.msra.mxu1 %v899_v44  ;;  %v975_v20 = vor.u32 %v1248_v17, %v974_v16  ;;  %v970_v23 = vld [vmem:[#allocation2 + $0x110] sm:$0xf]  ;;  %v939_v24 = vor.u32 %v1239_v22, %v938_v21  ;;  %v1247_v25 = vld [vmem:[#allocation2 + $0x114] sm:$0xf0]  ;;  %v934_v27 = vld [vmem:[#allocation2 + $0x80] sm:$0xf] }
  0x1a   :  { %v971_v26 = vor.u32 %v1247_v25, %v970_v23  ;;  %v1238_v28 = vld [vmem:[#allocation2 + $0x84] sm:$0xf0]  ;;  %v966_v29 = vld [vmem:[#allocation2 + $0x100] sm:$0xf]  ;;  %v1055_v33 = vld [vmem:[#allocation2 + $0x1f0] sm:$0xf] }
  0x1b   :  { %298 = vmatpush.bf16.msra.mxu2 %v951_v62  ;;  %v935_v30 = vor.u32 %v1238_v28, %v934_v27  ;;  %v1246_v31 = vld [vmem:[#allocation2 + $0x104] sm:$0xf0]  ;;  %v1269_v34 = vld [vmem:[#allocation2 + $0x1f4] sm:$0xf0]  ;;  %v1268_v35 = vld [vmem:[#allocation2 + $0x1f4] sm:$0xf] }
  0x1c   :  { %141 = vmatpush.bf16.msra.mxu0 %v887_v51  ;;  %311 = vmatpush.bf16.msra.mxu3 %v983_v1  ;;  %v967_v32 = vor.u32 %v1246_v31, %v966_v29  ;;  %v1056_v36 = vor.u32 %v1269_v34, %v1055_v33  ;;  %v1057_v37 = vld [vmem:[#allocation2 + $0x1f8] sm:$0xf0]  ;;  %v1047_v38 = vld [vmem:[#allocation2 + $0x1e0] sm:$0xf]  ;;  %v1267_v39 = vld [vmem:[#allocation2 + $0x1e4] sm:$0xf0] }
  0x1d   :  { %154 = vmatpush.bf16.msra.mxu1 %v891_v56  ;;  %v1060_v40 = vor.u32 %v1268_v35, %v1057_v37  ;;  %v1266_v41 = vld [vmem:[#allocation2 + $0x1e4] sm:$0xf]  ;;  %v1049_v42 = vld [vmem:[#allocation2 + $0x1e8] sm:$0xf0]  ;;  %v1048_v43 = vor.u32 %v1267_v39, %v1047_v38  ;;  %v1039_v45 = vld [vmem:[#allocation2 + $0x1d0] sm:$0xf] }
  0x1e   :  { %v1052_v44 = vor.u32 %v1266_v41, %v1049_v42  ;;  %v1265_v46 = vld [vmem:[#allocation2 + $0x1d4] sm:$0xf0]  ;;  %v1264_v47 = vld [vmem:[#allocation2 + $0x1d4] sm:$0xf]  ;;  %v1041_v48 = vld [vmem:[#allocation2 + $0x1d8] sm:$0xf0] }
  0x1f   :  { %299 = vmatpush.bf16.msra.mxu2 %v947_v10  ;;  %v1040_v49 = vor.u32 %v1265_v46, %v1039_v45  ;;  %v1044_v50 = vor.u32 %v1264_v47, %v1041_v48  ;;  %v1031_v51 = vld [vmem:[#allocation2 + $0x1c0] sm:$0xf]  ;;  %v1263_v52 = vld [vmem:[#allocation2 + $0x1c4] sm:$0xf0]  ;;  %v1262_v53 = vld [vmem:[#allocation2 + $0x1c4] sm:$0xf] }
  0x20   :  { %142 = vmatpush.bf16.msra.mxu0 %v879_v63  ;;  %312 = vmatpush.bf16.msra.mxu3 %v979_v12  ;;  %v1033_v54 = vld [vmem:[#allocation2 + $0x1c8] sm:$0xf0]  ;;  %v1032_v55 = vor.u32 %v1263_v52, %v1031_v51  ;;  %v1023_v57 = vld [vmem:[#allocation2 + $0x1b0] sm:$0xf]  ;;  %v1261_v58 = vld [vmem:[#allocation2 + $0x1b4] sm:$0xf0] }
  0x21   :  { %155 = vmatpush.bf16.msra.mxu1 %v883_v4  ;;  %v1036_v56 = vor.u32 %v1262_v53, %v1033_v54  ;;  %v1260_v59 = vld [vmem:[#allocation2 + $0x1b4] sm:$0xf]  ;;  %v1025_v60 = vld [vmem:[#allocation2 + $0x1b8] sm:$0xf0]  ;;  %v1024_v62 = vor.u32 %v1261_v58, %v1023_v57  ;;  %v1015_v0 = vld [vmem:[#allocation2 + $0x1a0] sm:$0xf] }
  0x22   :  { %v50_v61 = vld [vmem:[%s1418_s3] ss:$8 sm:$0x3]  ;;  %v1028_v63 = vor.u32 %v1260_v59, %v1025_v60  ;;  %v1258_v2 = vld [vmem:[#allocation2 + $0x1a4] sm:$0xf] }
  0x23   :  { %300 = vmatpush.bf16.msra.mxu2 %v943_v18  ;;  %v1259_v1 = vld [vmem:[#allocation2 + $0x1a4] sm:$0xf0]  ;;  %v1017_v3 = vld [vmem:[#allocation2 + $0x1a8] sm:$0xf0]  ;;  %v52_v5 = vperm.slane %v50_v61, 0  ;;  %v53_v7 = vperm.slane %v50_v61, 1 }
  0x24   :  { %143 = vmatpush.bf16.msra.mxu0 %v871_v11  ;;  %313 = vmatpush.bf16.msra.mxu3 %v975_v20  ;;  %v1016_v4 = vor.u32 %v1259_v1, %v1015_v0  ;;  %v1020_v6 = vor.u32 %v1258_v2, %v1017_v3  ;;  %v1007_v18 = vld [vmem:[#allocation2 + $0x190] sm:$0xf]  ;;  %v1256_v20 = vld [vmem:[#allocation2 + $0x194] sm:$0xf]  ;;  %v1009_v22 = vld [vmem:[#allocation2 + $0x198] sm:$0xf0] }
  0x25   :  { %156 = vmatpush.bf16.msra.mxu1 %v875_v15  ;;  %v1012_v23 = vor.u32 %v1256_v20, %v1009_v22  ;;  %v1255_v25 = vld [vmem:[#allocation2 + $0x184] sm:$0xf0]  ;;  %v1001_v28 = vld [vmem:[#allocation2 + $0x188] sm:$0xf0]  ;;  %v1277_v41 = vld [vmem:[#allocation2 + $0x274] sm:$0xf0] }
  0x26   :  { %v1390_v39 = vld [vmem:[%s1418_s3 + $0x2] ss:$8 sm:$0x3]  ;;  %v1083_v51 = vld [vmem:[#allocation2 + $0x250] sm:$0xf] }
  0x27   :  { %144 = vmatmul.bf16.vlgmr.msra.gmra.mxu0 %v33_v19  ;;  %301 = vmatpush.bf16.msra.mxu2 %v939_v24  ;;  %v999_v24 = vld [vmem:[#allocation2 + $0x180] sm:$0xf]  ;;  %v1276_v45 = vld [vmem:[#allocation2 + $0x264] sm:$0xf0]  ;;  %v1275_v52 = vld [vmem:[#allocation2 + $0x254] sm:$0xf0] }
  0x28   :  { %157 = vmatmul.bf16.vlgmr.msra.gmra.mxu1 %v33_v19  ;;  %314 = vmatpush.bf16.msra.mxu3 %v971_v26  ;;  %v1257_v19 = vld [vmem:[#allocation2 + $0x194] sm:$0xf0]  ;;  %v1254_v26 = vld [vmem:[#allocation2 + $0x184] sm:$0xf]  ;;  %v1000_v27 = vor.u32 %v1255_v25, %v999_v24  ;;  %v1084_v53 = vor.u32 %v1275_v52, %v1083_v51  ;;  %v1274_v57 = vld [vmem:[#allocation2 + $0x244] sm:$0xf0] }
  0x29   :  { %426 = vmatpush.bf16.msrb.mxu0 %v1056_v36  ;;  %439 = vmatpush.bf16.msrb.mxu1 %v1060_v40  ;;  %v1008_v21 = vor.u32 %v1257_v19, %v1007_v18  ;;  %v1004_v29 = vor.u32 %v1254_v26, %v1001_v28  ;;  %v1091_v40 = vld [vmem:[#allocation2 + $0x270] sm:$0xf]  ;;  %v1071_v1 = vld [vmem:[#allocation2 + $0x220] sm:$0xf]  ;;  %v1272_v2 = vld [vmem:[#allocation2 + $0x224] sm:$0xf0] }
  0x2a   :  { %v1092_v42 = vor.u32 %v1277_v41, %v1091_v40  ;;  %v1075_v61 = vld [vmem:[#allocation2 + $0x230] sm:$0xf]  ;;  %v1072_v3 = vor.u32 %v1272_v2, %v1071_v1  ;;  %v1293_v20 = vld [vmem:[#allocation2 + $0x2f4] sm:$0xf0]  ;;  %v1154_v24 = vld [vmem:[#allocation2 + $0x2f8] sm:$0xf0] }
  0x2b   :  { %302 = vmatpush.bf16.msra.mxu2 %v935_v30  ;;  %v198_v30 = vld [vmem:[%s1418_s3 + $0x1] ss:$0 sm:$0xff]  ;;  %v1152_v19 = vld [vmem:[#allocation2 + $0x2f0] sm:$0xf]  ;;  %v1291_v26 = vld [vmem:[#allocation2 + $0x2e4] sm:$0xf0] }
  0x2c   :  { %315 = vmatpush.bf16.msra.mxu3 %v967_v32  ;;  %v1144_v25 = vld [vmem:[#allocation2 + $0x2e0] sm:$0xf]  ;;  %v1285_v51 = vld [vmem:[#allocation2 + $0x2b4] sm:$0xf0]  ;;  %v1284_v52 = vld [vmem:[#allocation2 + $0x2b4] sm:$0xf] }
  0x2d   :  { %427 = vmatpush.bf16.msrb.mxu0 %v1048_v43  ;;  %440 = vmatpush.bf16.msrb.mxu1 %v1052_v44  ;;  %v343_v43 = vperm.slane %v1390_v39, 1  ;;  %v1087_v44 = vld [vmem:[#allocation2 + $0x260] sm:$0xf] }
  0x2e   :  { %v1088_v48 = vor.u32 %v1276_v45, %v1087_v44  ;;  %v1128_v41 = vld [vmem:[#allocation2 + $0x2c0] sm:$0xf]  ;;  %v1130_v44 = vld [vmem:[#allocation2 + $0x2c8] sm:$0xf0] }
  0x2f   :  { %554 = vmatpush.bf16.msrb.mxu2 %v1092_v42  ;;  %v1287_v42 = vld [vmem:[#allocation2 + $0x2c4] sm:$0xf0] }
  0x31   :  { %428 = vmatpush.bf16.msrb.mxu0 %v1040_v49  ;;  %441 = vmatpush.bf16.msrb.mxu1 %v1044_v50 }
  0x33   :  { %555 = vmatpush.bf16.msrb.mxu2 %v1088_v48 }
  0x35   :  { %429 = vmatpush.bf16.msrb.mxu0 %v1032_v55  ;;  %442 = vmatpush.bf16.msrb.mxu1 %v1036_v56  ;;  %v1079_v56 = vld [vmem:[#allocation2 + $0x240] sm:$0xf] }
  0x36   :  { %v1080_v60 = vor.u32 %v1274_v57, %v1079_v56 }
  0x37   :  { %556 = vmatpush.bf16.msrb.mxu2 %v1084_v53  ;;  %v1122_v53 = vld [vmem:[#allocation2 + $0x2b8] sm:$0xf0] }
  0x38   :  { %v1125_v57 = vor.u32 %v1284_v52, %v1122_v53  ;;  %v1297_v52 = vld [vmem:[#allocation2 + $0x334] sm:$0xf0] }
  0x39   :  { %430 = vmatpush.bf16.msrb.mxu0 %v1024_v62  ;;  %443 = vmatpush.bf16.msrb.mxu1 %v1028_v63  ;;  %v1273_v62 = vld [vmem:[#allocation2 + $0x234] sm:$0xf0] }
  0x3a   :  { %v1076_v0 = vor.u32 %v1273_v62, %v1075_v61  ;;  %v1114_v61 = vld [vmem:[#allocation2 + $0x2a8] sm:$0xf0] }
  0x3b   :  { %557 = vmatpush.bf16.msrb.mxu2 %v1080_v60  ;;  %v1282_v60 = vld [vmem:[#allocation2 + $0x2a4] sm:$0xf] }
  0x3c   :  { %v1117_v2 = vor.u32 %v1282_v60, %v1114_v61 }
  0x3d   :  { %431 = vmatpush.bf16.msrb.mxu0 %v1016_v4  ;;  %444 = vmatpush.bf16.msrb.mxu1 %v1020_v6  ;;  %v1067_v4 = vld [vmem:[#allocation2 + $0x210] sm:$0xf] }
  0x3f   :  { %558 = vmatpush.bf16.msrb.mxu2 %v1076_v0 }
  0x41   :  { %432 = vmatpush.bf16.msrb.mxu0 %v1008_v21  ;;  %445 = vmatpush.bf16.msrb.mxu1 %v1012_v23  ;;  %v1292_v21 = vld [vmem:[#allocation2 + $0x2f4] sm:$0xf]  ;;  %v1153_v23 = vor.u32 %v1293_v20, %v1152_v19  ;;  %v1279_v19 = vld [vmem:[#allocation2 + $0x284] sm:$0xf0]  ;;  %v1278_v20 = vld [vmem:[#allocation2 + $0x284] sm:$0xf] }
  0x42   :  { %v1157_v28 = vor.u32 %v1292_v21, %v1154_v24  ;;  %v1098_v21 = vld [vmem:[#allocation2 + $0x288] sm:$0xf0]  ;;  %v1309_v24 = vld [vmem:[#allocation2 + $0x3f4] sm:$0xf0] }
  0x43   :  { %559 = vmatpush.bf16.msrb.mxu2 %v1072_v3  ;;  %672 = vmatpush.bf16.msrb.mxu3 %v1153_v23  ;;  %v342_v3 = vperm.slane %v1390_v39, 0  ;;  %v1104_v39 = vld [vmem:[#allocation2 + $0x290] sm:$0xf] }
  0x44   :  { %v1220_v23 = vld [vmem:[#allocation2 + $0x3f0] sm:$0xf] }
  0x45   :  { %433 = vmatpush.bf16.msrb.mxu0 %v1000_v27  ;;  %446 = vmatpush.bf16.msrb.mxu1 %v1004_v29  ;;  %v1290_v29 = vld [vmem:[#allocation2 + $0x2e4] sm:$0xf] }
  0x49   :  { %685 = vmatpush.bf16.msra.mxu0 %v1157_v28  ;;  %v1188_v28 = vld [vmem:[#allocation2 + $0x370] sm:$0xf] }
  0xa4   :  { %v145_v8 = vpop.f32.mrf.mxu0 }
  0xa5   :  { %v146_v9 = vadd.f32 %v145_v8, %v52_v5  ;;  %v158_v10 = vpop.f32.mrf.mxu1  ;;  %v1271_v5 = vld [vmem:[#allocation2 + $0x214] sm:$0xf0] }
  0xa6   :  { %v159_v11 = vadd.f32 %v158_v10, %v53_v7  ;;  %v1068_v8 = vor.u32 %v1271_v5, %v1067_v4  ;;  %v1063_v10 = vld [vmem:[#allocation2 + $0x200] sm:$0xf] }
  0xa7   :  { %v162_v12 = vmax.f32 %v146_v9, 0.0 }
  0xa8   :  { %v163_v13 = vmax.f32 %v159_v11, 0.0  ;;  %v1270_v11 = vld [vmem:[#allocation2 + $0x204] sm:$0xf0]  ;;  %560 = vmatpush.bf16.msrb.mxu2 %v1068_v8 }
  0xa9   :  { %v164_v14 = vpack.c.bf16 %v162_v12, %v162_v12  ;;  %v1064_v12 = vor.u32 %v1270_v11, %v1063_v10 }
  0xaa   :  { %v165_v15 = vpack.c.bf16 %v163_v13, %v163_v13 }
  0xab   :  { %303 = vmatmul.bf16.vlgmr.msra.gmra.mxu2 %v164_v14 }
  0xac   :  { %316 = vmatmul.bf16.vlgmr.msra.gmra.mxu3 %v165_v15  ;;  %v147_v16 = vpop.f32.mrf.mxu0  ;;  %561 = vmatpush.bf16.msrb.mxu2 %v1064_v12 }
  0xad   :  { %v160_v17 = vpop.f32.mrf.mxu1 }
 0x12e   :  { %v304_v31 = vpop.f32.mrf.mxu2 }
 0x12f   :  { %v305_v32 = vadd.f32 %v304_v31, %v198_v30  ;;  %v317_v33 = vpop.f32.mrf.mxu3  ;;  %v1146_v30 = vld [vmem:[#allocation2 + $0x2e8] sm:$0xf0]  ;;  %v1145_v31 = vor.u32 %v1291_v26, %v1144_v25  ;;  %v1216_v25 = vld [vmem:[#allocation2 + $0x3e0] sm:$0xf]  ;;  %v1221_v26 = vor.u32 %v1309_v24, %v1220_v23 }
 0x131   :  { %v318_v34 = vadd.f32 %v317_v33, %v305_v32  ;;  %v1149_v33 = vor.u32 %v1290_v29, %v1146_v30  ;;  %673 = vmatpush.bf16.msrb.mxu3 %v1145_v31  ;;  %v1301_v29 = vld [vmem:[#allocation2 + $0x374] sm:$0xf0]  ;;  %v1184_v31 = vld [vmem:[#allocation2 + $0x360] sm:$0xf]  ;;  %844 = vmatpush.bf16.msra.mxu2 %v1221_v26  ;;  %v734_v26 = vld [vmem:[%s1418_s3 + $0x5] ss:$0 sm:$0xff] }
 0x132   :  { %v1189_v30 = vor.u32 %v1301_v29, %v1188_v28 }
 0x133   :  { %v321_v35 = vmax.f32 %v318_v34, 0.0  ;;  %v1136_v34 = vld [vmem:[#allocation2 + $0x2d0] sm:$0xf]  ;;  %686 = vmatpush.bf16.msra.mxu0 %v1149_v33  ;;  %v1300_v33 = vld [vmem:[#allocation2 + $0x364] sm:$0xf0] }
 0x134   :  { %831 = vmatpush.bf16.msra.mxu1 %v1189_v30 }
 0x135   :  { %v322_v36 = vpack.c.bf16 %v321_v35, %v321_v35  ;;  %v1289_v35 = vld [vmem:[#allocation2 + $0x2d4] sm:$0xf0] }
 0x136   :  { %v306_v37 = vpop.f32.mrf.mxu2 }
 0x137   :  { %v319_v38 = vpop.f32.mrf.mxu3  ;;  %434 = vmatmul.bf16.vlgmr.msrb.gmra.mxu0 %v322_v36  ;;  %447 = vmatmul.bf16.vlgmr.msrb.gmra.mxu1 %v322_v36  ;;  %v1288_v36 = vld [vmem:[#allocation2 + $0x2d4] sm:$0xf]  ;;  %v1138_v37 = vld [vmem:[#allocation2 + $0x2d8] sm:$0xf0] }
 0x138   :  { %v1137_v38 = vor.u32 %v1289_v35, %v1136_v34  ;;  %v1141_v40 = vor.u32 %v1288_v36, %v1138_v37  ;;  %v1212_v34 = vld [vmem:[#allocation2 + $0x3d0] sm:$0xf]  ;;  %v1307_v35 = vld [vmem:[#allocation2 + $0x3d4] sm:$0xf0]  ;;  %v1185_v36 = vor.u32 %v1300_v33, %v1184_v31 }
 0x139   :  { %v1180_v37 = vld [vmem:[#allocation2 + $0x350] sm:$0xf] }
 0x13a   :  { %674 = vmatpush.bf16.msrb.mxu3 %v1137_v38  ;;  %687 = vmatpush.bf16.msra.mxu0 %v1141_v40  ;;  %v1299_v38 = vld [vmem:[#allocation2 + $0x354] sm:$0xf0]  ;;  %v1213_v40 = vor.u32 %v1307_v35, %v1212_v34 }
 0x13b   :  { %832 = vmatpush.bf16.msra.mxu1 %v1185_v36 }
 0x1b4   :  { %v1393_v46 = vpop.f32.mrf.mxu0  ;;  %v448_v47 = vpop.f32.mrf.mxu1 }
 0x1b5   :  { %v449_v49 = vadd.f32 %v448_v47, %v343_v43  ;;  %v1286_v43 = vld [vmem:[#allocation2 + $0x2c4] sm:$0xf]  ;;  %v1129_v47 = vor.u32 %v1287_v42, %v1128_v41  ;;  %v1208_v41 = vld [vmem:[#allocation2 + $0x3c0] sm:$0xf]  ;;  %v1306_v42 = vld [vmem:[#allocation2 + $0x3c4] sm:$0xf0] }
 0x1b7   :  { %v453_v50 = vsub.f32 0.0, %v449_v49  ;;  %v452_v16 = vmax.f32 %v449_v49, 0.0  ;;  %675 = vmatpush.bf16.msrb.mxu3 %v1129_v47  ;;  %v1209_v47 = vor.u32 %v1306_v42, %v1208_v41 }
 0x1b9   :  { %v456_v54 = vand.u32 2147483647, %v453_v50  ;;  %vm454_vm1 = vcmp.ne.f32.partialorder %v453_v50, %v453_v50  ;;  %v1120_v50 = vld [vmem:[#allocation2 + $0x2b0] sm:$0xf] }
 0x1bb   :  { %v457_v55 = vsub.f32 0.0, %v456_v54 }
 0x1bc   :  { %v437_v58 = vpop.f32.mrf.mxu0  ;;  %v450_v59 = vpop.f32.mrf.mxu1 }
 0x1bd   :  { %v458_v63 = vmul.f32 1.442695, %v457_v55  ;;  %v1121_v55 = vor.u32 %v1285_v51, %v1120_v50  ;;  %v1112_v58 = vld [vmem:[#allocation2 + $0x2a0] sm:$0xf]  ;;  %v1283_v59 = vld [vmem:[#allocation2 + $0x2a4] sm:$0xf0] }
 0x1be   :  { %v1113_v0 = vor.u32 %v1283_v59, %v1112_v58  ;;  %v1172_v51 = vld [vmem:[#allocation2 + $0x330] sm:$0xf]  ;;  %v505_v58 = vld [vmem:[%s1418_s3 + $0x3] ss:$0 sm:$0xff] }
 0x1bf   :  { %1313 = vpow2.f32 %v458_v63  ;;  %v483_v63 = vld [vmem:[%s1416_s1] sm:$0xf]  ;;  %676 = vmatpush.bf16.msrb.mxu3 %v1121_v55  ;;  %v1304_v55 = vld [vmem:[#allocation2 + $0x3a4] sm:$0xf0] }
 0x1c0   :  { %v484_v5 = vunpack.c.l.bf16 %v483_v63 }
 0x1c3   :  { %677 = vmatpush.bf16.msrb.mxu3 %v1113_v0  ;;  %v1196_v0 = vld [vmem:[#allocation2 + $0x390] sm:$0xf] }
 0x1c5   :  { %v1314_v6 = vpop.eup %1313 }
 0x1c6   :  { %v460_v7 = vadd.f32 1.0, %v1314_v6  ;;  %v463_v9 = vmul.f32 -0.5, %v1314_v6  ;;  %v466_v14 = vand.u32 2147483647, %v1314_v6 }
 0x1c8   :  { %1315 = vlog2.f32 %v460_v7  ;;  %v464_v13 = vadd.f32 1.0, %v463_v9  ;;  %vm467_vm0 = vcmp.lt.f32.partialorder %v466_v14, 0.0004427343  ;;  %v436_v9 = vadd.f32 %v1393_v46, %v342_v3  ;;  %v1280_v14 = vld [vmem:[#allocation2 + $0x294] sm:$0xf] }
 0x1c9   :  { %v1168_v3 = vld [vmem:[#allocation2 + $0x320] sm:$0xf] }
 0x1ca   :  { %v465_v18 = vmul.f32 %v1314_v6, %v464_v13  ;;  %v1281_v13 = vld [vmem:[#allocation2 + $0x294] sm:$0xf0] }
 0x1ce   :  { %v1316_v15 = vpop.eup %1315 }
 0x1cf   :  { %v462_v17 = vmul.f32 0.6931472, %v1316_v15  ;;  %v1105_v15 = vor.u32 %v1281_v13, %v1104_v39  ;;  %v1294_v39 = vld [vmem:[#allocation2 + $0x304] sm:$0xf0] }
 0x1d1   :  { %v468_v22 = vsel %vm467_vm0, %v465_v18, %v462_v17  ;;  %678 = vmatpush.bf16.msrb.mxu3 %v1105_v15  ;;  %v1096_v18 = vld [vmem:[#allocation2 + $0x280] sm:$0xf] }
 0x1d2   :  { %v469_v27 = vadd.f32 %v468_v22, %v452_v16  ;;  %v1106_v16 = vld [vmem:[#allocation2 + $0x298] sm:$0xf0]  ;;  %v1097_v46 = vor.u32 %v1279_v19, %v1096_v18  ;;  %v1101_v22 = vor.u32 %v1278_v20, %v1098_v21 }
 0x1d3   :  { %v1109_v17 = vor.u32 %v1280_v14, %v1106_v16  ;;  %v1093_v14 = vld [vmem:[%s1418_s3 + $0x4] ss:$8 sm:$0x3] }
 0x1d4   :  { %v470_v32 = vsel %vm454_vm1, %v449_v49, %v469_v27  ;;  %v1133_v49 = vor.u32 %v1286_v43, %v1130_v44  ;;  %v1308_v27 = vld [vmem:[#allocation2 + $0x3e4] sm:$0xf0]  ;;  %v1181_v43 = vor.u32 %v1299_v38, %v1180_v37  ;;  %v1176_v44 = vld [vmem:[#allocation2 + $0x340] sm:$0xf]  ;;  %v589_v15 = vperm.slane %v1093_v14, 1 }
 0x1d5   :  { %1317 = vrsqrt.f32 %v470_v32  ;;  %vm478_vm2 = vcmp.eq.f32.partialorder %v470_v32, inf  ;;  %v481_v6 = vand.u32 2147483648, %v470_v32  ;;  %vm480_vm3 = vcmp.eq.f32.partialorder %v470_v32, 0.0  ;;  %679 = vmatpush.bf16.msrb.mxu3 %v1097_v46 }
 0x1d6   :  { %688 = vmatpush.bf16.msra.mxu0 %v1133_v49  ;;  %833 = vmatpush.bf16.msra.mxu1 %v1181_v43  ;;  %v1305_v49 = vld [vmem:[#allocation2 + $0x3b4] sm:$0xf0]  ;;  %v588_v19 = vperm.slane %v1093_v14, 0 }
 0x1da   :  { %689 = vmatpush.bf16.msra.mxu0 %v1125_v57 }
 0x1db   :  { %v1318_v45 = vpop.eup %1317 }
 0x1dc   :  { %v472_v48 = vmul.f32 %v1318_v45, %v470_v32 }
 0x1de   :  { %v473_v54 = vmul.f32 %v1318_v45, %v472_v48  ;;  %690 = vmatpush.bf16.msra.mxu0 %v1117_v2  ;;  %v1204_v48 = vld [vmem:[#allocation2 + $0x3b0] sm:$0xf] }
 0x1df   :  { %v1205_v53 = vor.u32 %v1305_v49, %v1204_v48 }
 0x1e0   :  { %v474_v56 = vmul.f32 0.5, %v473_v54  ;;  %v1200_v54 = vld [vmem:[#allocation2 + $0x3a0] sm:$0xf] }
 0x1e1   :  { %v1201_v57 = vor.u32 %v1304_v55, %v1200_v54 }
 0x1e2   :  { %v475_v62 = vsub.f32 1.5, %v474_v56  ;;  %691 = vmatpush.bf16.msra.mxu0 %v1109_v17  ;;  %v1173_v56 = vor.u32 %v1297_v52, %v1172_v51 }
 0x1e4   :  { %v476_v1 = vmul.f32 %v1318_v45, %v475_v62  ;;  %v1298_v45 = vld [vmem:[#allocation2 + $0x344] sm:$0xf0] }
 0x1e5   :  { %v1177_v50 = vor.u32 %v1298_v45, %v1176_v44 }
 0x1e6   :  { %v477_v4 = vmul.f32 %v476_v1, %v470_v32  ;;  %692 = vmatpush.bf16.msra.mxu0 %v1101_v22  ;;  %v1303_v1 = vld [vmem:[#allocation2 + $0x394] sm:$0xf0] }
 0x1e7   :  { %834 = vmatpush.bf16.msra.mxu1 %v1177_v50  ;;  %v1197_v2 = vor.u32 %v1303_v1, %v1196_v0 }
 0x1e8   :  { %v479_v7 = vsel %vm478_vm2, %v470_v32, %v477_v4  ;;  %v1217_v32 = vor.u32 %v1308_v27, %v1216_v25  ;;  %v1296_v4 = vld [vmem:[#allocation2 + $0x324] sm:$0xf0] }
 0x1e9   :  { %v482_v8 = vsel %vm480_vm3, %v481_v6, %v479_v7  ;;  %v1192_v6 = vld [vmem:[#allocation2 + $0x380] sm:$0xf]  ;;  %v1302_v7 = vld [vmem:[#allocation2 + $0x384] sm:$0xf0] }
 0x1ea   :  { %v485_v10 = vmul.f32 %v484_v5, %v482_v8  ;;  %845 = vmatpush.bf16.msra.mxu2 %v1217_v32  ;;  %v1169_v5 = vor.u32 %v1296_v4, %v1168_v3  ;;  %v1193_v8 = vor.u32 %v1302_v7, %v1192_v6 }
 0x1eb   :  { %835 = vmatpush.bf16.msra.mxu1 %v1173_v56 }
 0x1ec   :  { %v486_v11 = vadd.f32 %v485_v10, %v436_v9  ;;  %v1164_v9 = vld [vmem:[#allocation2 + $0x310] sm:$0xf]  ;;  %v1295_v10 = vld [vmem:[#allocation2 + $0x314] sm:$0xf0] }
 0x1ee   :  { %v487_v12 = vpack.c.bf16 %v486_v11, %v486_v11  ;;  %846 = vmatpush.bf16.msra.mxu2 %v1213_v40  ;;  %v1165_v11 = vor.u32 %v1295_v10, %v1164_v9 }
 0x1ef   :  { %836 = vmatpush.bf16.msra.mxu1 %v1169_v5 }
 0x1f0   :  { %488 = vst [vmem:[%s1419_s4 + $0x4] sm:$0xf] %v487_v12  ;;  %562 = vmatmul.bf16.vlgmr.msrb.gmra.mxu2 %v487_v12  ;;  %v1160_v12 = vld [vmem:[#allocation2 + $0x300] sm:$0xf] }
 0x1f1   :  { %v1161_v13 = vor.u32 %v1294_v39, %v1160_v12 }
 0x1f2   :  { %847 = vmatpush.bf16.msra.mxu2 %v1209_v47 }
 0x1f3   :  { %837 = vmatpush.bf16.msra.mxu1 %v1165_v11 }
 0x1f6   :  { %848 = vmatpush.bf16.msra.mxu2 %v1205_v53 }
 0x1f7   :  { %838 = vmatpush.bf16.msra.mxu1 %v1161_v13 }
 0x1fa   :  { %849 = vmatpush.bf16.msra.mxu2 %v1201_v57 }
 0x1fe   :  { %850 = vmatpush.bf16.msra.mxu2 %v1197_v2 }
 0x202   :  { %851 = vmatpush.bf16.msra.mxu2 %v1193_v8 }
 0x273   :  { %v563_v59 = vpop.f32.mrf.mxu2 }
 0x274   :  { %v564_v60 = vadd.f32 %v563_v59, %v505_v58 }
 0x276   :  { %v567_v61 = vmax.f32 %v564_v60, 0.0 }
 0x278   :  { %v568_v62 = vpack.c.bf16 %v567_v61, %v567_v61 }
 0x27a   :  { %680 = vmatmul.bf16.vlgmr.msrb.gmra.mxu3 %v568_v62  ;;  %693 = vmatmul.bf16.vlgmr.msra.gmra.mxu0 %v568_v62 }
 0x27b   :  { %v565_v63 = vpop.f32.mrf.mxu2 }
 0x2f7   :  { %v694_v16 = vpop.f32.mrf.mxu0 }
 0x2f8   :  { %v695_v17 = vadd.f32 %v694_v16, %v589_v15 }
 0x2fa   :  { %v699_v18 = vmax.f32 %v695_v17, 0.0 }
 0x2fc   :  { %v701_v20 = vpack.c.bf16 %v699_v18, %v699_v18 }
 0x2fd   :  { %v681_v46 = vpop.f32.mrf.mxu3 }
 0x2fe   :  { %v682_v21 = vadd.f32 %v681_v46, %v588_v19  ;;  %852 = vmatmul.bf16.vlgmr.msra.gmra.mxu2 %v701_v20 }
 0x2ff   :  { %v696_v22 = vpop.f32.mrf.mxu0 }
 0x300   :  { %v698_v23 = vmax.f32 %v682_v21, 0.0 }
 0x302   :  { %v700_v24 = vpack.c.bf16 %v698_v23, %v698_v23 }
 0x304   :  { %839 = vmatmul.bf16.vlgmr.msra.gmra.mxu1 %v700_v24 }
 0x305   :  { %v683_v25 = vpop.f32.mrf.mxu3 }
 0x381   :  { %v840_v27 = vpop.f32.mrf.mxu1  ;;  %v853_v28 = vpop.f32.mrf.mxu2 }
 0x382   :  { %v841_v29 = vadd.f32 %v840_v27, %v734_v26 }
 0x384   :  { %v854_v30 = vadd.f32 %v853_v28, %v841_v29 }
 0x386   :  { %v857_v31 = vmul.f32 0.5, %v854_v30 }
 0x388   :  { %1319 = vtanh.f32 %v857_v31 }
 0x389   :  { %v842_v32 = vpop.f32.mrf.mxu1  ;;  %v855_v33 = vpop.f32.mrf.mxu2 }
 0x38e   :  { %v1320_v34 = vpop.eup %1319 }
 0x38f   :  { %v859_v35 = vmul.f32 0.5, %v1320_v34 }
 0x391   :  { %v860_v36 = vadd.f32 0.5, %v859_v35 }
 0x393   :  { %v861_v37 = vpack.c.bf16 %v860_v36, %v860_v36 }
 0x395   :  { %862 = vst [vmem:[%s1419_s4] sm:$0xf] %v861_v37 }
 0x396   :  { %867 = vsyncpa [#allocation3], 1 }

</bundles_post_ra>
